<compile_context>
chip_gen: v7x
topology: tpu7x:2x2x1
jax: 0.10.0
libtpu: 0.0.40
codegen_flags: <defaults>
</compile_context>

<pallas_src>
import jax
import jax.numpy as jnp
from jax.experimental import pallas as pl
from jax.experimental.pallas import tpu as pltpu

IN_F = 28 * 28   # 784
H1_F = 512
H2_F = 256


def _round_up(x, m):
    return ((x + m - 1) // m) * m


def _pick_tb(B, block_b):
    """Pick the batch tile: 16-aligned, <= block_b, <= B, and (for medium or
    large B) giving at least 2 grid steps so v7x can shard the parallel axis
    across its two TensorCores."""
    if B <= 8:
        return B                                   # block == full array
    half = _round_up(pl.cdiv(B, 2), 16)            # aim for >= 2 steps
    tb = min(block_b, half)
    tb = min(tb, max(8, (B // 8) * 8))             # never exceed the array dim
    return max(tb, 8)


def _discriminator_kernel(x_ref, w1_ref, b1_ref, w2_ref, b2_ref, w3_ref, b3_ref,
                          o_ref):
    # In-kernel bf16 cast of the streamed x tile (VPU, hidden under the MXU).
    x_bf = x_ref[...].astype(jnp.bfloat16)
    # Layer 1: 784 -> 512 (bf16 MXU matmul, f32 accumulation) + LeakyReLU(0.2).
    h1 = jnp.dot(x_bf, w1_ref[...],
                 preferred_element_type=jnp.float32) + b1_ref[...]
    h1 = jnp.maximum(h1, 0.2 * h1)
    # Layer 2: 512 -> 256 (bf16 MXU matmul, f32 accumulation) + LeakyReLU(0.2).
    h2 = jnp.dot(h1.astype(jnp.bfloat16), w2_ref[...],
                 preferred_element_type=jnp.float32) + b2_ref[...]
    h2 = jnp.maximum(h2, 0.2 * h2)
    # Layer 3: 256 -> 1.  A (tb,256)x(256,1) matmul wastes the MXU; do a VPU
    # multiply + cross-lane reduction against the (1, 256) weight row instead.
    w3_row = w3_ref[...].astype(jnp.float32)                 # (1, 256)
    out = jnp.sum(h2 * w3_row, axis=-1, keepdims=True) + b3_ref[0, 0]
    o_ref[...] = out.astype(o_ref.dtype)


def discriminator_forward(x, params, *, block_b=1024):
    """x: (B, 1, 28, 28) float32 NCHW (bf16 also accepted).
    Returns validity scores (B, 1) float32."""
    w1, b1, w2, b2, w3, b3 = params
    B = x.shape[0]
    x2d = x.reshape(B, -1)            # == x.view(B, -1); NO wrapper cast / pad.

    # Weights are small and DMA'd once (constant index_map): cast once here so
    # they stay VMEM-resident in bf16.  Biases stay f32; b3 is an SMEM scalar.
    w1_bf = w1.astype(jnp.bfloat16)                           # (784, 512)
    w2_bf = w2.astype(jnp.bfloat16)                           # (512, 256)
    w3_row = w3.reshape(1, -1).astype(jnp.bfloat16)           # (1, 256)
    b1_r = b1.reshape(1, -1).astype(jnp.float32)              # (1, 512)
    b2_r = b2.reshape(1, -1).astype(jnp.float32)              # (1, 256)
    b3_s = b3.reshape(1, 1).astype(jnp.float32)               # scalar -> SMEM

    tb = _pick_tb(B, block_b)
    nb = pl.cdiv(B, tb)               # trailing partial block handled by Pallas

    x_bytes = B * IN_F * x2d.dtype.itemsize
    flops = 2 * B * (IN_F * H1_F + H1_F * H2_F + H2_F)
    bytes_accessed = (x_bytes + w1_bf.size * 2 + w2_bf.size * 2
                      + w3_row.size * 2 + b1_r.size * 4 + b2_r.size * 4 + 4
                      + B * 4)

    out = pl.pallas_call(
        _discriminator_kernel,
        out_shape=jax.ShapeDtypeStruct((B, 1), jnp.float32),
        grid_spec=pltpu.PrefetchScalarGridSpec(
            num_scalar_prefetch=0,
            grid=(nb,),
            in_specs=[
                pl.BlockSpec((tb, IN_F), lambda i: (i, 0)),        # x tile
                pl.BlockSpec((IN_F, H1_F), lambda i: (0, 0)),      # W1 (resident)
                pl.BlockSpec((1, H1_F), lambda i: (0, 0)),         # b1
                pl.BlockSpec((H1_F, H2_F), lambda i: (0, 0)),      # W2 (resident)
                pl.BlockSpec((1, H2_F), lambda i: (0, 0)),         # b2
                pl.BlockSpec((1, H2_F), lambda i: (0, 0)),         # W3 row
                pl.BlockSpec(memory_space=pltpu.MemorySpace.SMEM), # b3 scalar
            ],
            out_specs=pl.BlockSpec((tb, 1), lambda i: (i, 0)),
        ),
        compiler_params=pltpu.CompilerParams(
            dimension_semantics=("parallel",),
            vmem_limit_bytes=32 * 1024 * 1024),
        cost_estimate=pl.CostEstimate(
            flops=flops, transcendentals=0, bytes_accessed=bytes_accessed),
    )(x2d, w1_bf, b1_r, w2_bf, b2_r, w3_row, b3_s)
    return out


def init_params(key):
    """PyTorch-style init: U(-1/sqrt(fan_in), 1/sqrt(fan_in)).
    Weights stored as (in, out) = transposed torch layout; biases as (1, out)."""
    dims = [(IN_F, H1_F), (H1_F, H2_F), (H2_F, 1)]
    params = []
    for (fan_in, fan_out) in dims:
        key, kw, kb = jax.random.split(key, 3)
        bound = 1.0 / (fan_in ** 0.5)
        w = jax.random.uniform(kw, (fan_in, fan_out), jnp.float32, -bound, bound)
        b = jax.random.uniform(kb, (1, fan_out), jnp.float32, -bound, bound)
        params += [w, b]
    return tuple(params)


def _reference_forward(x, params):
    """Pure-JAX reference mirroring the kernel's bf16-operand / f32-accumulate math."""
    w1, b1, w2, b2, w3, b3 = params
    h = x.reshape(x.shape[0], -1).astype(jnp.bfloat16)
    h = jnp.dot(h, w1.astype(jnp.bfloat16),
                preferred_element_type=jnp.float32) + b1
    h = jnp.maximum(h, 0.2 * h)
    h = jnp.dot(h.astype(jnp.bfloat16), w2.astype(jnp.bfloat16),
                preferred_element_type=jnp.float32) + b2
    h = jnp.maximum(h, 0.2 * h)
    w3_row = w3.reshape(1, -1).astype(jnp.bfloat16).astype(jnp.float32)
    return jnp.sum(h * w3_row, axis=-1, keepdims=True) + b3.reshape(1, 1)


if __name__ == "__main__":
    key = jax.random.PRNGKey(0)
    kx, kp = jax.random.split(key)
    B = 16
    x = jax.random.normal(kx, (B, 1, 28, 28), jnp.float32)  # NCHW like PyTorch
    params = init_params(kp)

    out = discriminator_forward(x, params)
    out = jax.block_until_ready(out)

    ref = _reference_forward(x, params)
    assert out.shape == (B, 1)
    assert jnp.allclose(out, ref, atol=1e-3, rtol=1e-3), "mismatch vs reference"
    print("KERNEL_OK")
</pallas_src>

<mosaic_0001>
module attributes {stable_mosaic.version = 11 : i64} {
  func.func @_discriminator_kernel(%arg0: i32, %arg1: memref<16x784xf32, #tpu.memory_space<vmem>>, %arg2: memref<784x512xbf16, #tpu.memory_space<vmem>>, %arg3: memref<1x512xf32, #tpu.memory_space<vmem>>, %arg4: memref<512x256xbf16, #tpu.memory_space<vmem>>, %arg5: memref<1x256xf32, #tpu.memory_space<vmem>>, %arg6: memref<1x256xbf16, #tpu.memory_space<vmem>>, %arg7: memref<1x1xf32, #tpu.memory_space<smem>>, %arg8: memref<16x1xf32, #tpu.memory_space<vmem>>) attributes {dimension_semantics = [#tpu.dimension_semantics<parallel>], iteration_bounds = array<i64: 1>, scalar_prefetch = 0 : i64, scratch_operands = 0 : i64, tpu.core_type = #tpu.core_type<tc>, window_params = [{transform_indices = @transform_0, window_bounds = array<i64: 16, 784>}, {pipeline_mode = #tpu.pipeline_mode<synchronous>, transform_indices = @transform_1, window_bounds = array<i64: 784, 512>}, {pipeline_mode = #tpu.pipeline_mode<synchronous>, transform_indices = @transform_2, window_bounds = array<i64: 1, 512>}, {pipeline_mode = #tpu.pipeline_mode<synchronous>, transform_indices = @transform_3, window_bounds = array<i64: 512, 256>}, {pipeline_mode = #tpu.pipeline_mode<synchronous>, transform_indices = @transform_4, window_bounds = array<i64: 1, 256>}, {pipeline_mode = #tpu.pipeline_mode<synchronous>, transform_indices = @transform_5, window_bounds = array<i64: 1, 256>}, {transform_indices = @transform_6, window_bounds = array<i64: 1, 1>}, {transform_indices = @transform_7, window_bounds = array<i64: 16, 1>}]} {
    %c0 = arith.constant 0 : index
    %c0_0 = arith.constant 0 : index
    %0 = vector.load %arg1[%c0, %c0_0] : memref<16x784xf32, #tpu.memory_space<vmem>>, vector<16x784xf32>
    %1 = arith.truncf %0 : vector<16x784xf32> to vector<16x784xbf16>
    %c0_1 = arith.constant 0 : index
    %c0_2 = arith.constant 0 : index
    %2 = vector.load %arg2[%c0_1, %c0_2] : memref<784x512xbf16, #tpu.memory_space<vmem>>, vector<784x512xbf16>
    %cst = arith.constant dense<0.000000e+00> : vector<16x512xf32>
    %3 = tpu.matmul %1, %2, %cst {dimension_numbers = #tpu.dot_dimension_numbers<[1], [0], [0], [1], [0, 0, 1, 1], [], []>} : vector<16x784xbf16>, vector<784x512xbf16>, vector<16x512xf32> -> vector<16x512xf32>
    %c0_3 = arith.constant 0 : index
    %c0_4 = arith.constant 0 : index
    %4 = vector.load %arg3[%c0_3, %c0_4] : memref<1x512xf32, #tpu.memory_space<vmem>>, vector<1x512xf32>
    %5 = vector.broadcast %4 : vector<1x512xf32> to vector<16x512xf32>
    %6 = arith.addf %3, %5 : vector<16x512xf32>
    %cst_5 = arith.constant 2.000000e-01 : f32
    %7 = vector.broadcast %cst_5 : f32 to vector<16x512xf32>
    %8 = arith.mulf %7, %6 : vector<16x512xf32>
    %9 = arith.maximumf %6, %8 : vector<16x512xf32>
    %10 = arith.truncf %9 : vector<16x512xf32> to vector<16x512xbf16>
    %c0_6 = arith.constant 0 : index
    %c0_7 = arith.constant 0 : index
    %11 = vector.load %arg4[%c0_6, %c0_7] : memref<512x256xbf16, #tpu.memory_space<vmem>>, vector<512x256xbf16>
    %cst_8 = arith.constant dense<0.000000e+00> : vector<16x256xf32>
    %12 = tpu.matmul %10, %11, %cst_8 {dimension_numbers = #tpu.dot_dimension_numbers<[1], [0], [0], [1], [0, 0, 1, 1], [], []>} : vector<16x512xbf16>, vector<512x256xbf16>, vector<16x256xf32> -> vector<16x256xf32>
    %c0_9 = arith.constant 0 : index
    %c0_10 = arith.constant 0 : index
    %13 = vector.load %arg5[%c0_9, %c0_10] : memref<1x256xf32, #tpu.memory_space<vmem>>, vector<1x256xf32>
    %14 = vector.broadcast %13 : vector<1x256xf32> to vector<16x256xf32>
    %15 = arith.addf %12, %14 : vector<16x256xf32>
    %cst_11 = arith.constant 2.000000e-01 : f32
    %16 = vector.broadcast %cst_11 : f32 to vector<16x256xf32>
    %17 = arith.mulf %16, %15 : vector<16x256xf32>
    %18 = arith.maximumf %15, %17 : vector<16x256xf32>
    %c0_12 = arith.constant 0 : index
    %c0_13 = arith.constant 0 : index
    %19 = vector.load %arg6[%c0_12, %c0_13] : memref<1x256xbf16, #tpu.memory_space<vmem>>, vector<1x256xbf16>
    %20 = arith.extf %19 : vector<1x256xbf16> to vector<1x256xf32>
    %21 = vector.broadcast %20 : vector<1x256xf32> to vector<16x256xf32>
    %22 = arith.mulf %18, %21 : vector<16x256xf32>
    %cst_14 = arith.constant dense<0.000000e+00> : vector<16xf32>
    %23 = vector.multi_reduction <add>, %22, %cst_14 [1] : vector<16x256xf32> to vector<16xf32>
    %24 = vector.shape_cast %23 : vector<16xf32> to vector<16x1xf32>
    %c0_15 = arith.constant 0 : index
    %c0_16 = arith.constant 0 : index
    %25 = memref.load %arg7[%c0_15, %c0_16] : memref<1x1xf32, #tpu.memory_space<smem>>
    %26 = vector.broadcast %25 : f32 to vector<16x1xf32>
    %27 = arith.addf %24, %26 : vector<16x1xf32>
    %c0_17 = arith.constant 0 : index
    %c0_18 = arith.constant 0 : index
    %28 = vector.load %arg8[%c0_17, %c0_18] : memref<16x1xf32, #tpu.memory_space<vmem>>, vector<16x1xf32>
    tpu.vector_store %arg8[%c0_17, %c0_18], %27 {strides = array<i32>} : memref<16x1xf32, #tpu.memory_space<vmem>>, vector<16x1xf32>,
    return
  }
  func.func @transform_0(%arg0: i32) -> (i32, i32) {
    %c0_i32 = arith.constant 0 : i32
    %c0_i32_0 = arith.constant 0 : i32
    return %arg0, %c0_i32 : i32, i32
  }
  func.func @transform_1(%arg0: i32) -> (i32, i32) {
    %c0_i32 = arith.constant 0 : i32
    %c0_i32_0 = arith.constant 0 : i32
    %c0_i32_1 = arith.constant 0 : i32
    return %c0_i32, %c0_i32_0 : i32, i32
  }
  func.func @transform_2(%arg0: i32) -> (i32, i32) {
    %c0_i32 = arith.constant 0 : i32
    %c0_i32_0 = arith.constant 0 : i32
    %c0_i32_1 = arith.constant 0 : i32
    return %c0_i32, %c0_i32_0 : i32, i32
  }
  func.func @transform_3(%arg0: i32) -> (i32, i32) {
    %c0_i32 = arith.constant 0 : i32
    %c0_i32_0 = arith.constant 0 : i32
    %c0_i32_1 = arith.constant 0 : i32
    return %c0_i32, %c0_i32_0 : i32, i32
  }
  func.func @transform_4(%arg0: i32) -> (i32, i32) {
    %c0_i32 = arith.constant 0 : i32
    %c0_i32_0 = arith.constant 0 : i32
    %c0_i32_1 = arith.constant 0 : i32
    return %c0_i32, %c0_i32_0 : i32, i32
  }
  func.func @transform_5(%arg0: i32) -> (i32, i32) {
    %c0_i32 = arith.constant 0 : i32
    %c0_i32_0 = arith.constant 0 : i32
    %c0_i32_1 = arith.constant 0 : i32
    return %c0_i32, %c0_i32_0 : i32, i32
  }
  func.func @transform_6(%arg0: i32) -> (i32, i32) {
    %c0_i32 = arith.constant 0 : i32
    %c0_i32_0 = arith.constant 0 : i32
    %c0_i32_1 = arith.constant 0 : i32
    return %c0_i32, %c0_i32_0 : i32, i32
  }
  func.func @transform_7(%arg0: i32) -> (i32, i32) {
    %c0_i32 = arith.constant 0 : i32
    %c0_i32_0 = arith.constant 0 : i32
    return %arg0, %c0_i32 : i32, i32
  }
}

</mosaic_0001>

<bundles_post_ra>
// kernel: tpu_custom_call.1
= control target key start
LH: loop header
LB: loop body
LE: loop exit
PB: predicated region body
PF: predicated region fallthrough
CT: control target
= control target key end

     0   :  { %13 = vsyncpa [#allocation4], 0  ;;  %s3121_s0 = inlined_call_operand.hbm [shape: f32[16,784], index: 0, kind: input, shape index: {}]   ;;  %s3122_s1 = inlined_call_operand.hbm [shape: bf16[784,512], index: 1, kind: input, shape index: {}]   ;;  %s3123_s2 = inlined_call_operand.vmem [shape: f32[1,512], index: 2, kind: input, shape index: {}]   ;;  %s3124_s3 = inlined_call_operand.hbm [shape: bf16[512,256], index: 3, kind: input, shape index: {}]   ;;  %s3125_s4 = inlined_call_operand.vmem [shape: f32[1,256], index: 4, kind: input, shape index: {}]   ;;  %s3126_s5 = inlined_call_operand.vmem [shape: bf16[1,256], index: 5, kind: input, shape index: {}]   ;;  %s3127_s6 = inlined_call_operand.<no memory space> [shape: f32[1,1], index: 6, kind: input, shape index: {}]   ;;  %s3128_s7 = inlined_call_operand.vmem [shape: f32[16,1], index: 7, kind: output, shape index: {}]  }
   0x1   :  { %14 = vsyncpa [#allocation6], 0  ;;  %s2962_s24 = smov [#allocation5]   ;;  %s2892_s28 = scalar_lea.hbm %s3122_s1, 25088 }
   0x2   :  { %s32_s25 = sshll.u32 %s2962_s24, 4  ;;  %p2893_p0 = scmp.ne.s32.totalorder %s3122_s1, %s2892_s28  ;;  %s33_s25 = int_to_ptr.vmem [resolvable:$true] %s32_s25 }
   0x3   :  { %p2896_p1 = scmp.lt.u32.totalorder %s2892_s28, %s3122_s1 }
   0x5   :  { %p2898_p2 = pnand %p2896_p1, %p2893_p0 }
   0x7   :  { %2901 = shalt.err (!%p2898_p2)
}
   0x8   :  { %s2902_s10 = scalar_lea.vmem %s33_s25, 25088  ;;  %p2907_p4 = scmp.lt.s32.totalorder %s33_s25, %s33_s25 }
   0x9   :  { %p2903_p3 = scmp.ne.s32.totalorder %s33_s25, %s2902_s10  ;;  %p2908_p5 = scmp.lt.s32.totalorder %s2902_s10, %s2902_s10 }
   0xb   :  { %p2909_p6 = por %p2908_p5, %p2907_p4 }
   0xd   :  { %p2910_p7 = pnand %p2909_p6, %p2903_p3 }
   0xf   :  { %2913 = shalt.err (!%p2910_p7)
}
  0x10   :  { %s2963_s11 = smov 256   ;;  %s2964_s12 = smov 16  }
  0x11   :  { %38 = dma.hbm_to_vmem [thread:$0]  %s3122_s1, 25088, %s33_s25, [#allocation6], %s2963_s11, %s2963_s11, %s2964_s12  }
  0x12   :  { %s2965_s15 = smov [#allocation3]   ;;  %s2914_s19 = scalar_lea.hbm %s3121_s0, 1792 }
  0x13   :  { %s20_s16 = sshll.u32 %s2965_s15, 4  ;;  %p2915_p8 = scmp.ne.s32.totalorder %s3121_s0, %s2914_s19  ;;  %s21_s16 = int_to_ptr.vmem [resolvable:$true] %s20_s16 }
  0x14   :  { %p2918_p9 = scmp.lt.u32.totalorder %s2914_s19, %s3121_s0 }
  0x16   :  { %p2920_p10 = pnand %p2918_p9, %p2915_p8 }
  0x18   :  { %2923 = shalt.err (!%p2920_p10)
}
  0x19   :  { %s2924_s24 = scalar_lea.vmem %s21_s16, 1792  ;;  %p2929_p12 = scmp.lt.s32.totalorder %s21_s16, %s21_s16 }
  0x1a   :  { %p2925_p11 = scmp.ne.s32.totalorder %s21_s16, %s2924_s24  ;;  %p2930_p13 = scmp.lt.s32.totalorder %s2924_s24, %s2924_s24 }
  0x1c   :  { %p2931_p0 = por %p2930_p13, %p2929_p12 }
  0x1e   :  { %p2932_p1 = pnand %p2931_p0, %p2925_p11 }
  0x20   :  { %2935 = shalt.err (!%p2932_p1)
}
  0x21   :  { %s2966_s1 = smov 896   ;;  %s2967_s25 = smov 56  }
  0x22   :  { %26 = dma.hbm_to_vmem [thread:$0]  %s3121_s0, 1792, %s21_s16, [#allocation4], %s2966_s1, %s2966_s1, %s2967_s25  }
  0x23   :  { %s2968_s28 = smov [#allocation7]   ;;  %s2936_s9 = scalar_lea.hbm %s3124_s3, 8192 }
  0x24   :  { %s46_s29 = sshll.u32 %s2968_s28, 4  ;;  %p2937_p2 = scmp.ne.s32.totalorder %s3124_s3, %s2936_s9  ;;  %s47_s29 = int_to_ptr.vmem [resolvable:$true] %s46_s29 }
  0x25   :  { %p2940_p3 = scmp.lt.u32.totalorder %s2936_s9, %s3124_s3 }
  0x27   :  { %p2942_p4 = pnand %p2940_p3, %p2937_p2 }
  0x29   :  { %2945 = shalt.err (!%p2942_p4)
}
  0x2a   :  { %s2946_s14 = scalar_lea.vmem %s47_s29, 8192  ;;  %p2951_p6 = scmp.lt.s32.totalorder %s47_s29, %s47_s29 }
  0x2b   :  { %p2947_p5 = scmp.ne.s32.totalorder %s47_s29, %s2946_s14  ;;  %p2952_p7 = scmp.lt.s32.totalorder %s2946_s14, %s2946_s14 }
  0x2d   :  { %p2953_p8 = por %p2952_p7, %p2951_p6 }
  0x2f   :  { %p2954_p9 = pnand %p2953_p8, %p2947_p5 }
  0x31   :  { %2957 = shalt.err (!%p2954_p9)
}
  0x32   :  { %s2969_s0 = smov 128   ;;  %s2970_s15 = smov 8  }
  0x33   :  { %52 = dma.hbm_to_vmem [thread:$0]  %s3124_s3, 8192, %s47_s29, [#allocation6], %s2969_s0, %s2969_s0, %s2970_s15  }
  0x34   :  { %2958 = dma.done.wait [#allocation4], 1792  }
  0x35   :  { %2959 = vsyncadd [#allocation4], 4294965504 }
  0x36   :  { %2960 = dma.done.wait [#allocation6], 33280  }
  0x37   :  { %2961 = vsyncadd [#allocation6], 4294934016  ;;  %v2502_v0 = vld [vmem:[#allocation5 + $0x4] ss:$16 sps:$4 sm:$0xff]   ;;  %v2506_v2 = vld [vmem:[#allocation5] ss:$16 sps:$4 sm:$0xff]  }
  0x38   :  { %v2504_v1 = vld [vmem:[#allocation5 + $0x204] ss:$16 sps:$4 sm:$0xff]   ;;  %1292 = vmatprep.subr.bf16.mxu1 %v2502_v0  ;;  %v2507_v3 = vld [vmem:[#allocation5 + $0x200] ss:$16 sps:$4 sm:$0xff]   ;;  %v70_v46 = vld [vmem:[#allocation3 + $0x8] sm:$0xff]  ;;  %vm1288_vm0 = vcmask 130048  }
  0x39   :  { %1335 = vmatprep.subr.bf16.mxu0 %v2504_v1  ;;  %v2508_v4 = vld [vmem:[#allocation5 + $0x24] ss:$16 sps:$4 sm:$0xff]   ;;  %1293 = vmatpush1.bf16.msra.mxu1 %v2506_v2  ;;  %v2512_v6 = vld [vmem:[#allocation5 + $0x20] ss:$16 sps:$4 sm:$0xff]   ;;  %v72_v51 = vld [vmem:[#allocation3 + $0x18] sm:$0xff]  ;;  %vm2181_vm1 = vcmask 7168  }
  0x3a   :  { %1336 = vmatpush1.bf16.msra.mxu0 %v2507_v3  ;;  %v2510_v5 = vld [vmem:[#allocation5 + $0x224] ss:$16 sps:$4 sm:$0xff]   ;;  %1294 = vmatprep.subr.bf16.mxu1 %v2508_v4  ;;  %v2513_v7 = vld [vmem:[#allocation5 + $0x220] ss:$16 sps:$4 sm:$0xff]  }
  0x3b   :  { %1337 = vmatprep.subr.bf16.mxu0 %v2510_v5  ;;  %v2514_v8 = vld [vmem:[#allocation5 + $0x44] ss:$16 sps:$4 sm:$0xff]   ;;  %v2518_v10 = vld [vmem:[#allocation5 + $0x40] ss:$16 sps:$4 sm:$0xff]  }
  0x3c   :  { %v2516_v9 = vld [vmem:[#allocation5 + $0x244] ss:$16 sps:$4 sm:$0xff]   ;;  %v2519_v11 = vld [vmem:[#allocation5 + $0x240] ss:$16 sps:$4 sm:$0xff]  }
  0x3d   :  { %1295 = vmatpush1.bf16.msra.mxu1 %v2512_v6  ;;  %v2520_v12 = vld [vmem:[#allocation5 + $0x64] ss:$16 sps:$4 sm:$0xff]   ;;  %v2524_v14 = vld [vmem:[#allocation5 + $0x60] ss:$16 sps:$4 sm:$0xff]  }
  0x3e   :  { %1338 = vmatpush1.bf16.msra.mxu0 %v2513_v7  ;;  %1296 = vmatprep.subr.bf16.mxu1 %v2514_v8  ;;  %v2522_v13 = vld [vmem:[#allocation5 + $0x264] ss:$16 sps:$4 sm:$0xff]   ;;  %v2525_v15 = vld [vmem:[#allocation5 + $0x260] ss:$16 sps:$4 sm:$0xff]   ;;  %v76_v7 = vld [vmem:[#allocation3 + $0x38] sm:$0xff] }
  0x3f   :  { %1339 = vmatprep.subr.bf16.mxu0 %v2516_v9  ;;  %v2526_v16 = vld [vmem:[#allocation5 + $0x84] ss:$16 sps:$4 sm:$0xff]   ;;  %v2530_v18 = vld [vmem:[#allocation5 + $0x80] ss:$16 sps:$4 sm:$0xff]  }
  0x40   :  { %v2528_v17 = vld [vmem:[#allocation5 + $0x284] ss:$16 sps:$4 sm:$0xff]   ;;  %v2531_v19 = vld [vmem:[#allocation5 + $0x280] ss:$16 sps:$4 sm:$0xff]  }
  0x41   :  { %1297 = vmatpush1.bf16.msra.mxu1 %v2518_v10  ;;  %v2532_v20 = vld [vmem:[#allocation5 + $0xa4] ss:$16 sps:$4 sm:$0xff]   ;;  %v2536_v22 = vld [vmem:[#allocation5 + $0xa0] ss:$16 sps:$4 sm:$0xff]   ;;  %v78_v10 = vld [vmem:[#allocation3 + $0x48] sm:$0xff] }
  0x42   :  { %1340 = vmatpush1.bf16.msra.mxu0 %v2519_v11  ;;  %1298 = vmatprep.subr.bf16.mxu1 %v2520_v12  ;;  %v2534_v21 = vld [vmem:[#allocation5 + $0x2a4] ss:$16 sps:$4 sm:$0xff]   ;;  %v2537_v23 = vld [vmem:[#allocation5 + $0x2a0] ss:$16 sps:$4 sm:$0xff]   ;;  %v2603_v11 = vld [vmem:[#allocation5 + $0xc] ss:$16 sps:$4 sm:$0xff]  }
  0x43   :  { %1341 = vmatprep.subr.bf16.mxu0 %v2522_v13  ;;  %v2538_v24 = vld [vmem:[#allocation5 + $0xc4] ss:$16 sps:$4 sm:$0xff]   ;;  %v2542_v26 = vld [vmem:[#allocation5 + $0xc0] ss:$16 sps:$4 sm:$0xff]  }
  0x44   :  { %v2540_v25 = vld [vmem:[#allocation5 + $0x2c4] ss:$16 sps:$4 sm:$0xff]   ;;  %v2543_v27 = vld [vmem:[#allocation5 + $0x2c0] ss:$16 sps:$4 sm:$0xff]  }
  0x45   :  { %1299 = vmatpush1.bf16.msra.mxu1 %v2524_v14  ;;  %v2544_v28 = vld [vmem:[#allocation5 + $0xe4] ss:$16 sps:$4 sm:$0xff]   ;;  %v2548_v30 = vld [vmem:[#allocation5 + $0xe0] ss:$16 sps:$4 sm:$0xff]   ;;  %v2601_v14 = vld [vmem:[#allocation5 + $0x8] ss:$16 sps:$4 sm:$0xff]  }
  0x46   :  { %1342 = vmatpush1.bf16.msra.mxu0 %v2525_v15  ;;  %1300 = vmatprep.subr.bf16.mxu1 %v2526_v16  ;;  %v2546_v29 = vld [vmem:[#allocation5 + $0x2e4] ss:$16 sps:$4 sm:$0xff]   ;;  %v2549_v31 = vld [vmem:[#allocation5 + $0x2e0] ss:$16 sps:$4 sm:$0xff]  }
  0x47   :  { %1343 = vmatprep.subr.bf16.mxu0 %v2528_v17  ;;  %v2550_v32 = vld [vmem:[#allocation5 + $0x104] ss:$16 sps:$4 sm:$0xff]   ;;  %v2554_v34 = vld [vmem:[#allocation5 + $0x100] ss:$16 sps:$4 sm:$0xff]   ;;  %v2609_v17 = vld [vmem:[#allocation5 + $0x2c] ss:$16 sps:$4 sm:$0xff]  }
  0x48   :  { %v2552_v33 = vld [vmem:[#allocation5 + $0x304] ss:$16 sps:$4 sm:$0xff]   ;;  %v2555_v35 = vld [vmem:[#allocation5 + $0x300] ss:$16 sps:$4 sm:$0xff]  }
  0x49   :  { %1301 = vmatpush1.bf16.msra.mxu1 %v2530_v18  ;;  %v2556_v36 = vld [vmem:[#allocation5 + $0x124] ss:$16 sps:$4 sm:$0xff]   ;;  %v2560_v38 = vld [vmem:[#allocation5 + $0x120] ss:$16 sps:$4 sm:$0xff]  }
  0x4a   :  { %1344 = vmatpush1.bf16.msra.mxu0 %v2531_v19  ;;  %1302 = vmatprep.subr.bf16.mxu1 %v2532_v20  ;;  %v2558_v37 = vld [vmem:[#allocation5 + $0x324] ss:$16 sps:$4 sm:$0xff]   ;;  %v2561_v39 = vld [vmem:[#allocation5 + $0x320] ss:$16 sps:$4 sm:$0xff]   ;;  %v2607_v19 = vld [vmem:[#allocation5 + $0x28] ss:$16 sps:$4 sm:$0xff]  }
  0x4b   :  { %1345 = vmatprep.subr.bf16.mxu0 %v2534_v21  ;;  %v2562_v40 = vld [vmem:[#allocation5 + $0x144] ss:$16 sps:$4 sm:$0xff]   ;;  %v2566_v42 = vld [vmem:[#allocation5 + $0x140] ss:$16 sps:$4 sm:$0xff]   ;;  %v2615_v21 = vld [vmem:[#allocation5 + $0x4c] ss:$16 sps:$4 sm:$0xff]  }
  0x4c   :  { %v2564_v41 = vld [vmem:[#allocation5 + $0x344] ss:$16 sps:$4 sm:$0xff]   ;;  %v2567_v43 = vld [vmem:[#allocation5 + $0x340] ss:$16 sps:$4 sm:$0xff]  }
  0x4d   :  { %1303 = vmatpush1.bf16.msra.mxu1 %v2536_v22  ;;  %v2568_v44 = vld [vmem:[#allocation5 + $0x164] ss:$16 sps:$4 sm:$0xff]   ;;  %v2572_v47 = vld [vmem:[#allocation5 + $0x160] ss:$16 sps:$4 sm:$0xff]  }
  0x4e   :  { %1346 = vmatpush1.bf16.msra.mxu0 %v2537_v23  ;;  %1304 = vmatprep.subr.bf16.mxu1 %v2538_v24  ;;  %v2570_v45 = vld [vmem:[#allocation5 + $0x364] ss:$16 sps:$4 sm:$0xff]   ;;  %v2573_v48 = vld [vmem:[#allocation5 + $0x360] ss:$16 sps:$4 sm:$0xff]   ;;  %v2613_v23 = vld [vmem:[#allocation5 + $0x48] ss:$16 sps:$4 sm:$0xff]  }
  0x4f   :  { %1347 = vmatprep.subr.bf16.mxu0 %v2540_v25  ;;  %v77_v49 = vld [vmem:[#allocation3 + $0x40] sm:$0xff]  ;;  %v79_v52 = vld [vmem:[#allocation3 + $0x50] sm:$0xff]  ;;  %v2621_v25 = vld [vmem:[#allocation5 + $0x6c] ss:$16 sps:$4 sm:$0xff]  }
  0x50   :  { %v3048_v50 = vpack.c.bf16 %v77_v49, %v70_v46  ;;  %v2574_v53 = vld [vmem:[#allocation5 + $0x184] ss:$16 sps:$4 sm:$0xff]   ;;  %v3050_v55 = vpack.c.bf16 %v79_v52, %v72_v51  ;;  %v2578_v56 = vld [vmem:[#allocation5 + $0x180] ss:$16 sps:$4 sm:$0xff]   ;;  %v2643_v46 = vld [vmem:[#allocation5 + $0xe8] ss:$16 sps:$4 sm:$0xff]  }
  0x51   :  { %1305 = vmatpush1.bf16.msra.mxu1 %v2542_v26  ;;  %v2576_v54 = vld [vmem:[#allocation5 + $0x384] ss:$16 sps:$4 sm:$0xff]   ;;  %v2579_v57 = vld [vmem:[#allocation5 + $0x380] ss:$16 sps:$4 sm:$0xff]   ;;  %v2657_v52 = vld [vmem:[#allocation5 + $0x12c] ss:$16 sps:$4 sm:$0xff]  }
  0x52   :  { %1348 = vmatpush1.bf16.msra.mxu0 %v2543_v27  ;;  %1306 = vmatprep.subr.bf16.mxu1 %v2544_v28  ;;  %v2580_v58 = vld [vmem:[#allocation5 + $0x1a4] ss:$16 sps:$4 sm:$0xff]   ;;  %v2584_v60 = vld [vmem:[#allocation5 + $0x1a0] ss:$16 sps:$4 sm:$0xff]   ;;  %v2619_v27 = vld [vmem:[#allocation5 + $0x68] ss:$16 sps:$4 sm:$0xff]  }
  0x53   :  { %1349 = vmatprep.subr.bf16.mxu0 %v2546_v29  ;;  %1324 = vmatprep.mubr.bf16.mxu1 %v3048_v50  ;;  %v2582_v59 = vld [vmem:[#allocation5 + $0x3a4] ss:$16 sps:$4 sm:$0xff]   ;;  %v2585_v61 = vld [vmem:[#allocation5 + $0x3a0] ss:$16 sps:$4 sm:$0xff]   ;;  %v2627_v29 = vld [vmem:[#allocation5 + $0x8c] ss:$16 sps:$4 sm:$0xff]  }
  0x54   :  { %1367 = vmatprep.mubr.bf16.mxu0 %v3050_v55  ;;  %v2586_v62 = vld [vmem:[#allocation5 + $0x1c4] ss:$16 sps:$4 sm:$0xff]   ;;  %v2590_v0 = vld [vmem:[#allocation5 + $0x1c0] ss:$16 sps:$4 sm:$0xff]  }
  0x55   :  { %1307 = vmatpush1.bf16.msra.mxu1 %v2548_v30  ;;  %v2588_v63 = vld [vmem:[#allocation5 + $0x3c4] ss:$16 sps:$4 sm:$0xff]   ;;  %v2591_v1 = vld [vmem:[#allocation5 + $0x3c0] ss:$16 sps:$4 sm:$0xff]  }
  0x56   :  { %1350 = vmatpush1.bf16.msra.mxu0 %v2549_v31  ;;  %1308 = vmatprep.subr.bf16.mxu1 %v2550_v32  ;;  %v2592_v2 = vld [vmem:[#allocation5 + $0x1e4] ss:$16 sps:$4 sm:$0xff]   ;;  %v2596_v4 = vld [vmem:[#allocation5 + $0x1e0] ss:$16 sps:$4 sm:$0xff]   ;;  %v2625_v31 = vld [vmem:[#allocation5 + $0x88] ss:$16 sps:$4 sm:$0xff]  }
  0x57   :  { %1351 = vmatprep.subr.bf16.mxu0 %v2552_v33  ;;  %v2594_v3 = vld [vmem:[#allocation5 + $0x3e4] ss:$16 sps:$4 sm:$0xff]   ;;  %v2597_v5 = vld [vmem:[#allocation5 + $0x3e0] ss:$16 sps:$4 sm:$0xff]   ;;  %v2633_v33 = vld [vmem:[#allocation5 + $0xac] ss:$16 sps:$4 sm:$0xff]  }
  0x58   :  { %v69_v6 = vld [vmem:[#allocation3] sm:$0xff]  ;;  %v71_v9 = vld [vmem:[#allocation3 + $0x10] sm:$0xff] }
  0x59   :  { %1309 = vmatpush1.bf16.msra.mxu1 %v2554_v34  ;;  %v2600_v8 = vld [vmem:[#allocation5 + $0x404] ss:$16 sps:$4 sm:$0xff]   ;;  %v3054_v12 = vpack.c.bf16 %v76_v7, %v69_v6  ;;  %v2598_v13 = vld [vmem:[#allocation5 + $0x400] ss:$16 sps:$4 sm:$0xff]   ;;  %v3056_v15 = vpack.c.bf16 %v78_v10, %v71_v9  ;;  %v2679_v7 = vld [vmem:[#allocation5 + $0x1a8] ss:$16 sps:$4 sm:$0xff]  }
  0x5a   :  { %1352 = vmatpush1.bf16.msra.mxu0 %v2555_v35  ;;  %1310 = vmatprep.subr.bf16.mxu1 %v2556_v36  ;;  %v2606_v16 = vld [vmem:[#allocation5 + $0x424] ss:$16 sps:$4 sm:$0xff]   ;;  %v2604_v18 = vld [vmem:[#allocation5 + $0x420] ss:$16 sps:$4 sm:$0xff]   ;;  %v2631_v35 = vld [vmem:[#allocation5 + $0xa8] ss:$16 sps:$4 sm:$0xff]  }
  0x5b   :  { %1353 = vmatprep.subr.bf16.mxu0 %v2558_v37  ;;  %v2612_v20 = vld [vmem:[#allocation5 + $0x444] ss:$16 sps:$4 sm:$0xff]   ;;  %v2610_v22 = vld [vmem:[#allocation5 + $0x440] ss:$16 sps:$4 sm:$0xff]   ;;  %v2639_v37 = vld [vmem:[#allocation5 + $0xcc] ss:$16 sps:$4 sm:$0xff]  }
  0x5c   :  { %v2618_v24 = vld [vmem:[#allocation5 + $0x464] ss:$16 sps:$4 sm:$0xff]   ;;  %v2616_v26 = vld [vmem:[#allocation5 + $0x460] ss:$16 sps:$4 sm:$0xff]   ;;  %v2687_v9 = vld [vmem:[#allocation5 + $0x1cc] ss:$16 sps:$4 sm:$0xff]  }
  0x5d   :  { %1311 = vmatpush1.bf16.msra.mxu1 %v2560_v38  ;;  %v2624_v28 = vld [vmem:[#allocation5 + $0x484] ss:$16 sps:$4 sm:$0xff]   ;;  %v2622_v30 = vld [vmem:[#allocation5 + $0x480] ss:$16 sps:$4 sm:$0xff]  }
  0x5e   :  { %1354 = vmatpush1.bf16.msra.mxu0 %v2561_v39  ;;  %1312 = vmatprep.subr.bf16.mxu1 %v2562_v40  ;;  %v2630_v32 = vld [vmem:[#allocation5 + $0x4a4] ss:$16 sps:$4 sm:$0xff]   ;;  %v2628_v34 = vld [vmem:[#allocation5 + $0x4a0] ss:$16 sps:$4 sm:$0xff]   ;;  %v2637_v39 = vld [vmem:[#allocation5 + $0xc8] ss:$16 sps:$4 sm:$0xff]  }
  0x5f   :  { %1355 = vmatprep.subr.bf16.mxu0 %v2564_v41  ;;  %v2636_v36 = vld [vmem:[#allocation5 + $0x4c4] ss:$16 sps:$4 sm:$0xff]   ;;  %v2634_v38 = vld [vmem:[#allocation5 + $0x4c0] ss:$16 sps:$4 sm:$0xff]   ;;  %v74_v41 = vld [vmem:[#allocation3 + $0x28] sm:$0xff] }
  0x60   :  { %v2642_v40 = vld [vmem:[#allocation5 + $0x4e4] ss:$16 sps:$4 sm:$0xff]   ;;  %v2646_v49 = vld [vmem:[#allocation5 + $0x500] ss:$16 sps:$4 sm:$0xff]  }
  0x61   :  { %1313 = vmatpush1.bf16.msra.mxu1 %v2566_v42  ;;  %v81_v42 = vld [vmem:[#allocation3 + $0x60] sm:$0xff] }
  0x62   :  { %1356 = vmatpush1.bf16.msra.mxu0 %v2567_v43  ;;  %1314 = vmatprep.subr.bf16.mxu1 %v2568_v44  ;;  %v2645_v43 = vld [vmem:[#allocation5 + $0xec] ss:$16 sps:$4 sm:$0xff]   ;;  %v3061_v44 = vpack.c.bf16 %v81_v42, %v74_v41  ;;  %v2654_v51 = vld [vmem:[#allocation5 + $0x524] ss:$16 sps:$4 sm:$0xff]   ;;  %v2676_v6 = vld [vmem:[#allocation5 + $0x5a0] ss:$16 sps:$4 sm:$0xff]  }
  0x63   :  { %1357 = vmatprep.subr.bf16.mxu0 %v2570_v45  ;;  %v2640_v45 = vld [vmem:[#allocation5 + $0x4e0] ss:$16 sps:$4 sm:$0xff]   ;;  %v2798_v41 = vld [vmem:[#allocation7 + $0x4] ss:$8 sps:$4 sm:$0xff]   ;;  %v2801_v42 = vld [vmem:[#allocation7 + $0x14] ss:$8 sps:$4 sm:$0xff]  }
  0x64   :  { %v2682_v10 = vld [vmem:[#allocation5 + $0x5c0] ss:$16 sps:$4 sm:$0xff]  }
  0x65   :  { %1315 = vmatpush1.bf16.msra.mxu1 %v2572_v47  ;;  %v2648_v47 = vld [vmem:[#allocation5 + $0x504] ss:$16 sps:$4 sm:$0xff]  }
  0x66   :  { %1358 = vmatpush1.bf16.msra.mxu0 %v2573_v48  ;;  %1316 = vmatprep.subr.bf16.mxu1 %v2574_v53  ;;  %v2651_v48 = vld [vmem:[#allocation5 + $0x10c] ss:$16 sps:$4 sm:$0xff]   ;;  %v2652_v53 = vld [vmem:[#allocation5 + $0x520] ss:$16 sps:$4 sm:$0xff]  }
  0x67   :  { %1359 = vmatprep.subr.bf16.mxu0 %v2576_v54  ;;  %v2655_v54 = vld [vmem:[#allocation5 + $0x128] ss:$16 sps:$4 sm:$0xff]  }
  0x69   :  { %1317 = vmatpush1.bf16.msra.mxu1 %v2578_v56  ;;  %v2660_v56 = vld [vmem:[#allocation5 + $0x544] ss:$16 sps:$4 sm:$0xff]  }
  0x6a   :  { %1360 = vmatpush1.bf16.msra.mxu0 %v2579_v57  ;;  %1318 = vmatprep.subr.bf16.mxu1 %v2580_v58  ;;  %v2663_v57 = vld [vmem:[#allocation5 + $0x14c] ss:$16 sps:$4 sm:$0xff]   ;;  %v2658_v58 = vld [vmem:[#allocation5 + $0x540] ss:$16 sps:$4 sm:$0xff]  }
  0x6b   :  { %1361 = vmatprep.subr.bf16.mxu0 %v2582_v59  ;;  %v2661_v59 = vld [vmem:[#allocation5 + $0x148] ss:$16 sps:$4 sm:$0xff]  }
  0x6d   :  { %1319 = vmatpush1.bf16.msra.mxu1 %v2584_v60  ;;  %v2666_v60 = vld [vmem:[#allocation5 + $0x564] ss:$16 sps:$4 sm:$0xff]  }
  0x6e   :  { %1362 = vmatpush1.bf16.msra.mxu0 %v2585_v61  ;;  %1320 = vmatprep.subr.bf16.mxu1 %v2586_v62  ;;  %v2669_v61 = vld [vmem:[#allocation5 + $0x16c] ss:$16 sps:$4 sm:$0xff]   ;;  %v2664_v62 = vld [vmem:[#allocation5 + $0x560] ss:$16 sps:$4 sm:$0xff]  }
  0x6f   :  { %1363 = vmatprep.subr.bf16.mxu0 %v2588_v63  ;;  %v2667_v63 = vld [vmem:[#allocation5 + $0x168] ss:$16 sps:$4 sm:$0xff]  }
  0x71   :  { %1321 = vmatpush1.bf16.msra.mxu1 %v2590_v0  ;;  %v2672_v0 = vld [vmem:[#allocation5 + $0x584] ss:$16 sps:$4 sm:$0xff]  }
  0x72   :  { %1364 = vmatpush1.bf16.msra.mxu0 %v2591_v1  ;;  %1322 = vmatprep.subr.bf16.mxu1 %v2592_v2  ;;  %v2675_v1 = vld [vmem:[#allocation5 + $0x18c] ss:$16 sps:$4 sm:$0xff]   ;;  %v2670_v2 = vld [vmem:[#allocation5 + $0x580] ss:$16 sps:$4 sm:$0xff]  }
  0x73   :  { %1365 = vmatprep.subr.bf16.mxu0 %v2594_v3  ;;  %v2673_v3 = vld [vmem:[#allocation5 + $0x188] ss:$16 sps:$4 sm:$0xff]  }
  0x75   :  { %1323 = vmatpush1.bf16.msra.mxu1 %v2596_v4  ;;  %v2678_v4 = vld [vmem:[#allocation5 + $0x5a4] ss:$16 sps:$4 sm:$0xff]  }
  0x76   :  { %1366 = vmatpush1.bf16.msra.mxu0 %v2597_v5  ;;  %1464 = vmatprep.subr.bf16.mxu1 %v2603_v11  ;;  %v2681_v5 = vld [vmem:[#allocation5 + $0x1ac] ss:$16 sps:$4 sm:$0xff]   ;;  %v2685_v11 = vld [vmem:[#allocation5 + $0x1c8] ss:$16 sps:$4 sm:$0xff]  }
  0x77   :  { %1378 = vmatprep.subr.bf16.mxu0 %v2600_v8  ;;  %v2684_v8 = vld [vmem:[#allocation5 + $0x5c4] ss:$16 sps:$4 sm:$0xff]  }
  0x78   :  { %1325 = vmatmul.mubr.bf16.vlgmr.msra.gmra.mrb[0].mxu1 %v3054_v12 }
  0x79   :  { %1368 = vmatmul.mubr.bf16.vlgmr.msra.gmra.mrb[0].mxu0 %v3056_v15  ;;  %1465 = vmatpush1.bf16.msra.mxu1 %v2601_v14  ;;  %v2693_v14 = vld [vmem:[#allocation5 + $0x1ec] ss:$16 sps:$4 sm:$0xff]  }
  0x7a   :  { %1379 = vmatpush1.bf16.msra.mxu0 %v2598_v13  ;;  %1466 = vmatprep.subr.bf16.mxu1 %v2609_v17  ;;  %v2690_v13 = vld [vmem:[#allocation5 + $0x5e4] ss:$16 sps:$4 sm:$0xff]   ;;  %v2691_v17 = vld [vmem:[#allocation5 + $0x1e8] ss:$16 sps:$4 sm:$0xff]  }
  0x7b   :  { %1380 = vmatprep.subr.bf16.mxu0 %v2606_v16  ;;  %1496 = vmatprep.mubr.bf16.mxu1 %v3048_v50  ;;  %v2649_v50 = vld [vmem:[#allocation5 + $0x108] ss:$16 sps:$4 sm:$0xff]   ;;  %v2688_v16 = vld [vmem:[#allocation5 + $0x5e0] ss:$16 sps:$4 sm:$0xff]  }
  0x7c   :  { %1410 = vmatprep.mubr.bf16.mxu0 %v3061_v44 }
  0x7d   :  { %1467 = vmatpush1.bf16.msra.mxu1 %v2607_v19  ;;  %v80_v19 = vld [vmem:[#allocation3 + $0x58] sm:$0xff] }
  0x7e   :  { %1381 = vmatpush1.bf16.msra.mxu0 %v2604_v18  ;;  %1468 = vmatprep.subr.bf16.mxu1 %v2615_v21  ;;  %v73_v18 = vld [vmem:[#allocation3 + $0x20] sm:$0xff] }
  0x7f   :  { %1382 = vmatprep.subr.bf16.mxu0 %v2612_v20  ;;  %v2696_v20 = vld [vmem:[#allocation5 + $0x20c] ss:$16 sps:$4 sm:$0xff]   ;;  %v2702_v21 = vld [vmem:[#allocation5 + $0x604] ss:$16 sps:$4 sm:$0xff]  }
  0x81   :  { %1469 = vmatpush1.bf16.msra.mxu1 %v2613_v23  ;;  %v2694_v23 = vld [vmem:[#allocation5 + $0x208] ss:$16 sps:$4 sm:$0xff]  }
  0x82   :  { %1383 = vmatpush1.bf16.msra.mxu0 %v2610_v22  ;;  %1470 = vmatprep.subr.bf16.mxu1 %v2621_v25  ;;  %v3064_v22 = vpack.c.bf16 %v80_v19, %v73_v18  ;;  %v2699_v25 = vld [vmem:[#allocation5 + $0x22c] ss:$16 sps:$4 sm:$0xff]   ;;  %v2745_v19 = vld [vmem:[#allocation5 + $0x408] ss:$16 sps:$4 sm:$0xff]  }
  0x83   :  { %1384 = vmatprep.subr.bf16.mxu0 %v2618_v24  ;;  %v2700_v24 = vld [vmem:[#allocation5 + $0x600] ss:$16 sps:$4 sm:$0xff]   ;;  %v2828_v18 = vld [vmem:[#allocation7 + $0xa4] ss:$8 sps:$4 sm:$0xff]  }
  0x85   :  { %1471 = vmatpush1.bf16.msra.mxu1 %v2619_v27  ;;  %v2705_v27 = vld [vmem:[#allocation5 + $0x24c] ss:$16 sps:$4 sm:$0xff]  }
  0x86   :  { %1385 = vmatpush1.bf16.msra.mxu0 %v2616_v26  ;;  %1472 = vmatprep.subr.bf16.mxu1 %v2627_v29  ;;  %v2697_v26 = vld [vmem:[#allocation5 + $0x228] ss:$16 sps:$4 sm:$0xff]  }
  0x87   :  { %1386 = vmatprep.subr.bf16.mxu0 %v2624_v28  ;;  %v2971_v28 = vmov 0   ;;  %v2703_v29 = vld [vmem:[#allocation5 + $0x248] ss:$16 sps:$4 sm:$0xff]  }
  0x89   :  { %1473 = vmatpush1.bf16.msra.mxu1 %v2625_v31  ;;  %v82_v31 = vld [vmem:[#allocation3 + $0x68] sm:$0xff] }
  0x8a   :  { %1387 = vmatpush1.bf16.msra.mxu0 %v2622_v30  ;;  %1474 = vmatprep.subr.bf16.mxu1 %v2633_v33  ;;  %v75_v30 = vld [vmem:[#allocation3 + $0x30] sm:$0xff]  ;;  %v2706_v33 = vld [vmem:[#allocation5 + $0x268] ss:$16 sps:$4 sm:$0xff]  }
  0x8b   :  { %1388 = vmatprep.subr.bf16.mxu0 %v2630_v32  ;;  %v2708_v32 = vld [vmem:[#allocation5 + $0x26c] ss:$16 sps:$4 sm:$0xff]  }
  0x8d   :  { %1475 = vmatpush1.bf16.msra.mxu1 %v2631_v35  ;;  %v2709_v35 = vld [vmem:[#allocation5 + $0x288] ss:$16 sps:$4 sm:$0xff]  }
  0x8e   :  { %1389 = vmatpush1.bf16.msra.mxu0 %v2628_v34  ;;  %1476 = vmatprep.subr.bf16.mxu1 %v2639_v37  ;;  %v3070_v34 = vpack.c.bf16 %v82_v31, %v75_v30  ;;  %v2712_v37 = vld [vmem:[#allocation5 + $0x2a8] ss:$16 sps:$4 sm:$0xff]   ;;  %v2756_v30 = vld [vmem:[#allocation5 + $0x46c] ss:$16 sps:$4 sm:$0xff]  }
  0x8f   :  { %1390 = vmatprep.subr.bf16.mxu0 %v2636_v36  ;;  %v2714_v36 = vld [vmem:[#allocation5 + $0x2ac] ss:$16 sps:$4 sm:$0xff]   ;;  %v2832_v31 = vld [vmem:[#allocation7 + $0xc0] ss:$8 sps:$4 sm:$0xff]  }
  0x91   :  { %1477 = vmatpush1.bf16.msra.mxu1 %v2637_v39  ;;  %v2720_v39 = vld [vmem:[#allocation5 + $0x2ec] ss:$16 sps:$4 sm:$0xff]  }
  0x92   :  { %1391 = vmatpush1.bf16.msra.mxu0 %v2634_v38  ;;  %1478 = vmatprep.subr.bf16.mxu1 %v2645_v43  ;;  %v2717_v38 = vld [vmem:[#allocation5 + $0x2cc] ss:$16 sps:$4 sm:$0xff]   ;;  %v2718_v43 = vld [vmem:[#allocation5 + $0x2e8] ss:$16 sps:$4 sm:$0xff]  }
  0x93   :  { %1392 = vmatprep.subr.bf16.mxu0 %v2642_v40  ;;  %v2796_v40 = vld [vmem:[#allocation7] ss:$8 sps:$4 sm:$0xff]  }
  0x95   :  { %1479 = vmatpush1.bf16.msra.mxu1 %v2643_v46  ;;  %v2799_v46 = vld [vmem:[#allocation7 + $0x10] ss:$8 sps:$4 sm:$0xff]  }
  0x96   :  { %1393 = vmatpush1.bf16.msra.mxu0 %v2640_v45  ;;  %1480 = vmatprep.subr.bf16.mxu1 %v2651_v48  ;;  %v2723_v45 = vld [vmem:[#allocation5 + $0x30c] ss:$16 sps:$4 sm:$0xff]   ;;  %v2721_v48 = vld [vmem:[#allocation5 + $0x308] ss:$16 sps:$4 sm:$0xff]  }
  0x97   :  { %1394 = vmatprep.subr.bf16.mxu0 %v2648_v47  ;;  %v2804_v47 = vld [vmem:[#allocation7 + $0x24] ss:$8 sps:$4 sm:$0xff]  }
  0x99   :  { %1481 = vmatpush1.bf16.msra.mxu1 %v2649_v50  ;;  %v2802_v50 = vld [vmem:[#allocation7 + $0x20] ss:$8 sps:$4 sm:$0xff]  }
  0x9a   :  { %1395 = vmatpush1.bf16.msra.mxu0 %v2646_v49  ;;  %1482 = vmatprep.subr.bf16.mxu1 %v2657_v52  ;;  %v2726_v49 = vld [vmem:[#allocation5 + $0x32c] ss:$16 sps:$4 sm:$0xff]  }
  0x9b   :  { %1396 = vmatprep.subr.bf16.mxu0 %v2654_v51  ;;  %v2724_v51 = vld [vmem:[#allocation5 + $0x328] ss:$16 sps:$4 sm:$0xff]   ;;  %v2807_v52 = vld [vmem:[#allocation7 + $0x34] ss:$8 sps:$4 sm:$0xff]  }
  0x9d   :  { %1483 = vmatpush1.bf16.msra.mxu1 %v2655_v54  ;;  %v2805_v54 = vld [vmem:[#allocation7 + $0x30] ss:$8 sps:$4 sm:$0xff]  }
  0x9e   :  { %1397 = vmatpush1.bf16.msra.mxu0 %v2652_v53  ;;  %1484 = vmatprep.subr.bf16.mxu1 %v2663_v57  ;;  %v2729_v53 = vld [vmem:[#allocation5 + $0x34c] ss:$16 sps:$4 sm:$0xff]   ;;  %v2727_v57 = vld [vmem:[#allocation5 + $0x348] ss:$16 sps:$4 sm:$0xff]  }
  0x9f   :  { %1398 = vmatprep.subr.bf16.mxu0 %v2660_v56  ;;  %v2810_v56 = vld [vmem:[#allocation7 + $0x44] ss:$8 sps:$4 sm:$0xff]  }
  0xa1   :  { %1485 = vmatpush1.bf16.msra.mxu1 %v2661_v59  ;;  %v2808_v59 = vld [vmem:[#allocation7 + $0x40] ss:$8 sps:$4 sm:$0xff]  }
  0xa2   :  { %1399 = vmatpush1.bf16.msra.mxu0 %v2658_v58  ;;  %1486 = vmatprep.subr.bf16.mxu1 %v2669_v61  ;;  %v2732_v58 = vld [vmem:[#allocation5 + $0x36c] ss:$16 sps:$4 sm:$0xff]   ;;  %v2730_v61 = vld [vmem:[#allocation5 + $0x368] ss:$16 sps:$4 sm:$0xff]  }
  0xa3   :  { %1400 = vmatprep.subr.bf16.mxu0 %v2666_v60  ;;  %v2813_v60 = vld [vmem:[#allocation7 + $0x54] ss:$8 sps:$4 sm:$0xff]  }
  0xa5   :  { %1487 = vmatpush1.bf16.msra.mxu1 %v2667_v63  ;;  %v2811_v63 = vld [vmem:[#allocation7 + $0x50] ss:$8 sps:$4 sm:$0xff]  }
  0xa6   :  { %1401 = vmatpush1.bf16.msra.mxu0 %v2664_v62  ;;  %1488 = vmatprep.subr.bf16.mxu1 %v2675_v1  ;;  %v2735_v62 = vld [vmem:[#allocation5 + $0x38c] ss:$16 sps:$4 sm:$0xff]   ;;  %v2733_v1 = vld [vmem:[#allocation5 + $0x388] ss:$16 sps:$4 sm:$0xff]  }
  0xa7   :  { %1402 = vmatprep.subr.bf16.mxu0 %v2672_v0  ;;  %v2816_v0 = vld [vmem:[#allocation7 + $0x64] ss:$8 sps:$4 sm:$0xff]  }
  0xa9   :  { %1489 = vmatpush1.bf16.msra.mxu1 %v2673_v3  ;;  %v2814_v3 = vld [vmem:[#allocation7 + $0x60] ss:$8 sps:$4 sm:$0xff]  }
  0xaa   :  { %1403 = vmatpush1.bf16.msra.mxu0 %v2670_v2  ;;  %1490 = vmatprep.subr.bf16.mxu1 %v2681_v5  ;;  %v2738_v2 = vld [vmem:[#allocation5 + $0x3ac] ss:$16 sps:$4 sm:$0xff]   ;;  %v2736_v5 = vld [vmem:[#allocation5 + $0x3a8] ss:$16 sps:$4 sm:$0xff]  }
  0xab   :  { %1404 = vmatprep.subr.bf16.mxu0 %v2678_v4  ;;  %v2819_v4 = vld [vmem:[#allocation7 + $0x74] ss:$8 sps:$4 sm:$0xff]  }
  0xad   :  { %1491 = vmatpush1.bf16.msra.mxu1 %v2679_v7  ;;  %v2817_v7 = vld [vmem:[#allocation7 + $0x70] ss:$8 sps:$4 sm:$0xff]  }
  0xae   :  { %1405 = vmatpush1.bf16.msra.mxu0 %v2676_v6  ;;  %1492 = vmatprep.subr.bf16.mxu1 %v2687_v9  ;;  %v2741_v6 = vld [vmem:[#allocation5 + $0x3cc] ss:$16 sps:$4 sm:$0xff]   ;;  %v2739_v9 = vld [vmem:[#allocation5 + $0x3c8] ss:$16 sps:$4 sm:$0xff]  }
  0xaf   :  { %1406 = vmatprep.subr.bf16.mxu0 %v2684_v8  ;;  %v2822_v8 = vld [vmem:[#allocation7 + $0x84] ss:$8 sps:$4 sm:$0xff]  }
  0xb1   :  { %1493 = vmatpush1.bf16.msra.mxu1 %v2685_v11  ;;  %v2820_v11 = vld [vmem:[#allocation7 + $0x80] ss:$8 sps:$4 sm:$0xff]  }
  0xb2   :  { %1407 = vmatpush1.bf16.msra.mxu0 %v2682_v10  ;;  %1494 = vmatprep.subr.bf16.mxu1 %v2693_v14  ;;  %v2744_v10 = vld [vmem:[#allocation5 + $0x3ec] ss:$16 sps:$4 sm:$0xff]   ;;  %v2742_v14 = vld [vmem:[#allocation5 + $0x3e8] ss:$16 sps:$4 sm:$0xff]  }
  0xb3   :  { %1408 = vmatprep.subr.bf16.mxu0 %v2690_v13  ;;  %v2825_v13 = vld [vmem:[#allocation7 + $0x94] ss:$8 sps:$4 sm:$0xff]  }
  0xb5   :  { %1495 = vmatpush1.bf16.msra.mxu1 %v2691_v17  ;;  %v2823_v17 = vld [vmem:[#allocation7 + $0x90] ss:$8 sps:$4 sm:$0xff]  }
  0xb6   :  { %1409 = vmatpush1.bf16.msra.mxu0 %v2688_v16  ;;  %1507 = vmatprep.subr.bf16.mxu1 %v2696_v20  ;;  %v2747_v16 = vld [vmem:[#allocation5 + $0x40c] ss:$16 sps:$4 sm:$0xff]  }
  0xb7   :  { %1421 = vmatprep.subr.bf16.mxu0 %v2702_v21  ;;  %v2750_v20 = vld [vmem:[#allocation5 + $0x42c] ss:$16 sps:$4 sm:$0xff]   ;;  %v2826_v21 = vld [vmem:[#allocation7 + $0xa0] ss:$8 sps:$4 sm:$0xff]  }
  0xb8   :  { %1497 = vmatmul.mubr.bf16.vlgmr.msra.gmra.mrb[4].mxu1 %v3054_v12  ;;  %v2711_v12 = vld [vmem:[#allocation5 + $0x28c] ss:$16 sps:$4 sm:$0xff]  }
  0xb9   :  { %1411 = vmatmul.mubr.bf16.vlgmr.msra.gmra.mrb[0].mxu0 %v3064_v22  ;;  %1508 = vmatpush1.bf16.msra.mxu1 %v2694_v23  ;;  %v2831_v23 = vld [vmem:[#allocation7 + $0xb4] ss:$8 sps:$4 sm:$0xff]  }
  0xba   :  { %1422 = vmatpush1.bf16.msra.mxu0 %v2700_v24  ;;  %1509 = vmatprep.subr.bf16.mxu1 %v2699_v25  ;;  %v2748_v24 = vld [vmem:[#allocation5 + $0x428] ss:$16 sps:$4 sm:$0xff]   ;;  %v2753_v25 = vld [vmem:[#allocation5 + $0x44c] ss:$16 sps:$4 sm:$0xff]  }
  0xbb   :  { %1453 = vmatprep.mubr.bf16.mxu0 %v2971_v28  ;;  %1539 = vmatprep.mubr.bf16.mxu1 %v3050_v55  ;;  %v2715_v55 = vld [vmem:[#allocation5 + $0x2c8] ss:$16 sps:$4 sm:$0xff]  }
  0xbc   :  { %2052 = vmatprep.subr.bf16.mxu0 %v2798_v41  ;;  %v2837_v41 = vld [vmem:[#allocation7 + $0xd4] ss:$8 sps:$4 sm:$0xff]  }
  0xbd   :  { %1510 = vmatpush1.bf16.msra.mxu1 %v2697_v26  ;;  %v2829_v26 = vld [vmem:[#allocation7 + $0xb0] ss:$8 sps:$4 sm:$0xff]  }
  0xbe   :  { %1511 = vmatprep.subr.bf16.mxu1 %v2705_v27  ;;  %v2834_v27 = vld [vmem:[#allocation7 + $0xc4] ss:$8 sps:$4 sm:$0xff]  }
  0xc1   :  { %1512 = vmatpush1.bf16.msra.mxu1 %v2703_v29  ;;  %v2751_v29 = vld [vmem:[#allocation5 + $0x448] ss:$16 sps:$4 sm:$0xff]  }
  0xc2   :  { %1513 = vmatprep.subr.bf16.mxu1 %v2708_v32  ;;  %v2754_v32 = vld [vmem:[#allocation5 + $0x468] ss:$16 sps:$4 sm:$0xff]  }
  0xc5   :  { %2386 = vmatmul.mubr.msk.bf16.vlgmr.msra.gmra.mrb[0].mxu0 %vm1288_vm0, %v3070_v34  ;;  %1514 = vmatpush1.bf16.msra.mxu1 %v2706_v33  ;;  %v2762_v33 = vld [vmem:[#allocation5 + $0x4ac] ss:$16 sps:$4 sm:$0xff]  }
  0xc6   :  { %1515 = vmatprep.subr.bf16.mxu1 %v2711_v12  ;;  %2053 = vmatpush1.bf16.msra.mxu0 %v2796_v40  ;;  %v2760_v12 = vld [vmem:[#allocation5 + $0x4a8] ss:$16 sps:$4 sm:$0xff]   ;;  %v2774_v40 = vld [vmem:[#allocation5 + $0x52c] ss:$16 sps:$4 sm:$0xff]  }
  0xc7   :  { %2054 = vmatprep.subr.bf16.mxu0 %v2801_v42  ;;  %v2835_v42 = vld [vmem:[#allocation7 + $0xd0] ss:$8 sps:$4 sm:$0xff]  }
  0xc9   :  { %1516 = vmatpush1.bf16.msra.mxu1 %v2709_v35  ;;  %v2765_v35 = vld [vmem:[#allocation5 + $0x4cc] ss:$16 sps:$4 sm:$0xff]  }
  0xca   :  { %1517 = vmatprep.subr.bf16.mxu1 %v2714_v36  ;;  %2055 = vmatpush1.bf16.msra.mxu0 %v2799_v46  ;;  %v2763_v36 = vld [vmem:[#allocation5 + $0x4c8] ss:$16 sps:$4 sm:$0xff]   ;;  %v2840_v46 = vld [vmem:[#allocation7 + $0xe4] ss:$8 sps:$4 sm:$0xff]  }
  0xcb   :  { %2056 = vmatprep.subr.bf16.mxu0 %v2804_v47  ;;  %v2838_v47 = vld [vmem:[#allocation7 + $0xe0] ss:$8 sps:$4 sm:$0xff]  }
  0xcd   :  { %1518 = vmatpush1.bf16.msra.mxu1 %v2712_v37  ;;  %v2768_v37 = vld [vmem:[#allocation5 + $0x4ec] ss:$16 sps:$4 sm:$0xff]  }
  0xce   :  { %1519 = vmatprep.subr.bf16.mxu1 %v2717_v38  ;;  %2057 = vmatpush1.bf16.msra.mxu0 %v2802_v50  ;;  %v2766_v38 = vld [vmem:[#allocation5 + $0x4e8] ss:$16 sps:$4 sm:$0xff]   ;;  %v2843_v50 = vld [vmem:[#allocation7 + $0xf4] ss:$8 sps:$4 sm:$0xff]  }
  0xcf   :  { %2058 = vmatprep.subr.bf16.mxu0 %v2807_v52  ;;  %v2778_v52 = vld [vmem:[#allocation5 + $0x568] ss:$16 sps:$4 sm:$0xff]  }
  0xd1   :  { %1520 = vmatpush1.bf16.msra.mxu1 %v2715_v55  ;;  %v2771_v55 = vld [vmem:[#allocation5 + $0x50c] ss:$16 sps:$4 sm:$0xff]  }
  0xd2   :  { %1521 = vmatprep.subr.bf16.mxu1 %v2720_v39  ;;  %2059 = vmatpush1.bf16.msra.mxu0 %v2805_v54  ;;  %v2769_v39 = vld [vmem:[#allocation5 + $0x508] ss:$16 sps:$4 sm:$0xff]   ;;  %v2846_v54 = vld [vmem:[#allocation7 + $0x104] ss:$8 sps:$4 sm:$0xff]  }
  0xd3   :  { %2060 = vmatprep.subr.bf16.mxu0 %v2810_v56  ;;  %v2781_v56 = vld [vmem:[#allocation5 + $0x588] ss:$16 sps:$4 sm:$0xff]  }
  0xd5   :  { %1522 = vmatpush1.bf16.msra.mxu1 %v2718_v43  ;;  %v2772_v43 = vld [vmem:[#allocation5 + $0x528] ss:$16 sps:$4 sm:$0xff]  }
  0xd6   :  { %1523 = vmatprep.subr.bf16.mxu1 %v2723_v45  ;;  %2061 = vmatpush1.bf16.msra.mxu0 %v2808_v59  ;;  %v2777_v45 = vld [vmem:[#allocation5 + $0x54c] ss:$16 sps:$4 sm:$0xff]  }
  0xd7   :  { %2062 = vmatprep.subr.bf16.mxu0 %v2813_v60  ;;  %v2789_v59 = vld [vmem:[#allocation5 + $0x5cc] ss:$16 sps:$4 sm:$0xff]   ;;  %v2787_v60 = vld [vmem:[#allocation5 + $0x5c8] ss:$16 sps:$4 sm:$0xff]  }
  0xd9   :  { %1524 = vmatpush1.bf16.msra.mxu1 %v2721_v48  ;;  %v2775_v48 = vld [vmem:[#allocation5 + $0x548] ss:$16 sps:$4 sm:$0xff]  }
  0xda   :  { %1525 = vmatprep.subr.bf16.mxu1 %v2726_v49  ;;  %2063 = vmatpush1.bf16.msra.mxu0 %v2811_v63  ;;  %v2780_v49 = vld [vmem:[#allocation5 + $0x56c] ss:$16 sps:$4 sm:$0xff]  }
  0xdb   :  { %2064 = vmatprep.subr.bf16.mxu0 %v2816_v0  ;;  %v2795_v63 = vld [vmem:[#allocation5 + $0x60c] ss:$16 sps:$4 sm:$0xff]   ;;  %v2793_v0 = vld [vmem:[#allocation5 + $0x608] ss:$16 sps:$4 sm:$0xff]  }
  0xdd   :  { %1526 = vmatpush1.bf16.msra.mxu1 %v2724_v51  ;;  %v2841_v51 = vld [vmem:[#allocation7 + $0xf0] ss:$8 sps:$4 sm:$0xff]  }
  0xde   :  { %1527 = vmatprep.subr.bf16.mxu1 %v2729_v53  ;;  %2065 = vmatpush1.bf16.msra.mxu0 %v2814_v3  ;;  %v2783_v53 = vld [vmem:[#allocation5 + $0x58c] ss:$16 sps:$4 sm:$0xff]  }
  0xdf   :  { %2066 = vmatprep.subr.bf16.mxu0 %v2819_v4 }
  0xe1   :  { %1528 = vmatpush1.bf16.msra.mxu1 %v2727_v57  ;;  %v2786_v57 = vld [vmem:[#allocation5 + $0x5ac] ss:$16 sps:$4 sm:$0xff]  }
  0xe2   :  { %1529 = vmatprep.subr.bf16.mxu1 %v2732_v58  ;;  %2067 = vmatpush1.bf16.msra.mxu0 %v2817_v7  ;;  %v2784_v58 = vld [vmem:[#allocation5 + $0x5a8] ss:$16 sps:$4 sm:$0xff]  }
  0xe3   :  { %2068 = vmatprep.subr.bf16.mxu0 %v2822_v8 }
  0xe5   :  { %1530 = vmatpush1.bf16.msra.mxu1 %v2730_v61  ;;  %v2792_v61 = vld [vmem:[#allocation5 + $0x5ec] ss:$16 sps:$4 sm:$0xff]  }
  0xe6   :  { %1531 = vmatprep.subr.bf16.mxu1 %v2735_v62  ;;  %2069 = vmatpush1.bf16.msra.mxu0 %v2820_v11  ;;  %v2790_v62 = vld [vmem:[#allocation5 + $0x5e8] ss:$16 sps:$4 sm:$0xff]  }
  0xe7   :  { %2070 = vmatprep.subr.bf16.mxu0 %v2825_v13 }
  0xe9   :  { %1532 = vmatpush1.bf16.msra.mxu1 %v2733_v1 }
  0xea   :  { %1533 = vmatprep.subr.bf16.mxu1 %v2738_v2  ;;  %2071 = vmatpush1.bf16.msra.mxu0 %v2823_v17 }
  0xeb   :  { %2072 = vmatprep.subr.bf16.mxu0 %v2828_v18 }
  0xed   :  { %1534 = vmatpush1.bf16.msra.mxu1 %v2736_v5  ;;  %v288_v5 = vlaneseq }
  0xee   :  { %1535 = vmatprep.subr.bf16.mxu1 %v2741_v6  ;;  %2073 = vmatpush1.bf16.msra.mxu0 %v2826_v21 }
  0xef   :  { %2074 = vmatprep.subr.bf16.mxu0 %v2831_v23  ;;  %v3080_v6 = vshrl.u32 %v288_v5, 7 }
  0xf1   :  { %1536 = vmatpush1.bf16.msra.mxu1 %v2739_v9  ;;  %v3083_v7 = vsub.s32 0, %v3080_v6 }
  0xf2   :  { %1537 = vmatprep.subr.bf16.mxu1 %v2744_v10  ;;  %2075 = vmatpush1.bf16.msra.mxu0 %v2829_v26 }
  0xf3   :  { %2076 = vmatprep.subr.bf16.mxu0 %v2834_v27 }
  0xf5   :  { %1538 = vmatpush1.bf16.msra.mxu1 %v2742_v14 }
  0xf6   :  { %1550 = vmatprep.subr.bf16.mxu1 %v2747_v16  ;;  %2077 = vmatpush1.bf16.msra.mxu0 %v2832_v31 }
  0xf7   :  { %2078 = vmatprep.subr.bf16.mxu0 %v2837_v41  ;;  %v2861_v41 = vld [vmem:[#allocation7 + $0x154] ss:$8 sps:$4 sm:$0xff]  }
  0xf8   :  { %1540 = vmatmul.mubr.bf16.vlgmr.msra.gmra.mrb[4].mxu1 %v3056_v15  ;;  %v2759_v15 = vld [vmem:[#allocation5 + $0x48c] ss:$16 sps:$4 sm:$0xff]  }
  0xf9   :  { %1551 = vmatpush1.bf16.msra.mxu1 %v2745_v19  ;;  %1582 = vmatprep.mubr.bf16.mxu1 %v3061_v44  ;;  %v2757_v44 = vld [vmem:[#allocation5 + $0x488] ss:$16 sps:$4 sm:$0xff]  }
  0xfa   :  { %1552 = vmatprep.subr.bf16.mxu1 %v2750_v20  ;;  %2079 = vmatpush1.bf16.msra.mxu0 %v2835_v42  ;;  %v2859_v42 = vld [vmem:[#allocation7 + $0x150] ss:$8 sps:$4 sm:$0xff]  }
  0xfb   :  { %2080 = vmatprep.subr.bf16.mxu0 %v2840_v46  ;;  %v2867_v46 = vld [vmem:[#allocation7 + $0x174] ss:$8 sps:$4 sm:$0xff]  }
  0xfd   :  { %1553 = vmatpush1.bf16.msra.mxu1 %v2748_v24 }
  0xfe   :  { %1554 = vmatprep.subr.bf16.mxu1 %v2753_v25  ;;  %2081 = vmatpush1.bf16.msra.mxu0 %v2838_v47  ;;  %v2865_v47 = vld [vmem:[#allocation7 + $0x170] ss:$8 sps:$4 sm:$0xff]  }
  0xff   :  { %2082 = vmatprep.subr.bf16.mxu0 %v2843_v50  ;;  %v2873_v50 = vld [vmem:[#allocation7 + $0x194] ss:$8 sps:$4 sm:$0xff]  }
 0x101   :  { %1555 = vmatpush1.bf16.msra.mxu1 %v2751_v29 }
 0x102   :  { %1556 = vmatprep.subr.bf16.mxu1 %v2756_v30  ;;  %2083 = vmatpush1.bf16.msra.mxu0 %v2841_v51  ;;  %v2871_v51 = vld [vmem:[#allocation7 + $0x190] ss:$8 sps:$4 sm:$0xff]  }
 0x103   :  { %2095 = vmatprep.subr.bf16.mxu0 %v2846_v54  ;;  %v2879_v54 = vld [vmem:[#allocation7 + $0x1b4] ss:$8 sps:$4 sm:$0xff]  }
 0x105   :  { %1557 = vmatpush1.bf16.msra.mxu1 %v2754_v32 }
 0x106   :  { %1558 = vmatprep.subr.bf16.mxu1 %v2759_v15 }
 0x109   :  { %1559 = vmatpush1.bf16.msra.mxu1 %v2757_v44 }
 0x10a   :  { %1560 = vmatprep.subr.bf16.mxu1 %v2762_v33  ;;  %v2844_v33 = vld [vmem:[#allocation7 + $0x100] ss:$8 sps:$4 sm:$0xff]  }
 0x10d   :  { %1561 = vmatpush1.bf16.msra.mxu1 %v2760_v12  ;;  %v2849_v12 = vld [vmem:[#allocation7 + $0x114] ss:$8 sps:$4 sm:$0xff]  }
 0x10e   :  { %1562 = vmatprep.subr.bf16.mxu1 %v2765_v35  ;;  %v2847_v35 = vld [vmem:[#allocation7 + $0x110] ss:$8 sps:$4 sm:$0xff]  }
 0x111   :  { %1563 = vmatpush1.bf16.msra.mxu1 %v2763_v36  ;;  %v2852_v36 = vld [vmem:[#allocation7 + $0x124] ss:$8 sps:$4 sm:$0xff]  }
 0x112   :  { %1564 = vmatprep.subr.bf16.mxu1 %v2768_v37  ;;  %v2850_v37 = vld [vmem:[#allocation7 + $0x120] ss:$8 sps:$4 sm:$0xff]  }
 0x115   :  { %1565 = vmatpush1.bf16.msra.mxu1 %v2766_v38  ;;  %v2855_v38 = vld [vmem:[#allocation7 + $0x134] ss:$8 sps:$4 sm:$0xff]  }
 0x116   :  { %1566 = vmatprep.subr.bf16.mxu1 %v2771_v55  ;;  %v2853_v55 = vld [vmem:[#allocation7 + $0x130] ss:$8 sps:$4 sm:$0xff]  }
 0x119   :  { %1567 = vmatpush1.bf16.msra.mxu1 %v2769_v39  ;;  %v2858_v39 = vld [vmem:[#allocation7 + $0x144] ss:$8 sps:$4 sm:$0xff]  }
 0x11a   :  { %1568 = vmatprep.subr.bf16.mxu1 %v2774_v40  ;;  %v2856_v40 = vld [vmem:[#allocation7 + $0x140] ss:$8 sps:$4 sm:$0xff]  }
 0x11d   :  { %1569 = vmatpush1.bf16.msra.mxu1 %v2772_v43  ;;  %v2864_v43 = vld [vmem:[#allocation7 + $0x164] ss:$8 sps:$4 sm:$0xff]  }
 0x11e   :  { %1570 = vmatprep.subr.bf16.mxu1 %v2777_v45  ;;  %v2862_v45 = vld [vmem:[#allocation7 + $0x160] ss:$8 sps:$4 sm:$0xff]  }
 0x121   :  { %1571 = vmatpush1.bf16.msra.mxu1 %v2775_v48  ;;  %v2870_v48 = vld [vmem:[#allocation7 + $0x184] ss:$8 sps:$4 sm:$0xff]  }
 0x122   :  { %1572 = vmatprep.subr.bf16.mxu1 %v2780_v49  ;;  %v2868_v49 = vld [vmem:[#allocation7 + $0x180] ss:$8 sps:$4 sm:$0xff]  }
 0x125   :  { %1573 = vmatpush1.bf16.msra.mxu1 %v2778_v52  ;;  %v2876_v52 = vld [vmem:[#allocation7 + $0x1a4] ss:$8 sps:$4 sm:$0xff]  }
 0x126   :  { %1574 = vmatprep.subr.bf16.mxu1 %v2783_v53  ;;  %v2874_v53 = vld [vmem:[#allocation7 + $0x1a0] ss:$8 sps:$4 sm:$0xff]  }
 0x129   :  { %1575 = vmatpush1.bf16.msra.mxu1 %v2781_v56  ;;  %v2877_v56 = vld [vmem:[#allocation7 + $0x1b0] ss:$8 sps:$4 sm:$0xff]  }
 0x12a   :  { %1576 = vmatprep.subr.bf16.mxu1 %v2786_v57  ;;  %v2882_v57 = vld [vmem:[#allocation7 + $0x1c4] ss:$8 sps:$4 sm:$0xff]  }
 0x12d   :  { %1577 = vmatpush1.bf16.msra.mxu1 %v2784_v58  ;;  %v2880_v58 = vld [vmem:[#allocation7 + $0x1c0] ss:$8 sps:$4 sm:$0xff]  }
 0x12e   :  { %1578 = vmatprep.subr.bf16.mxu1 %v2789_v59  ;;  %v2885_v59 = vld [vmem:[#allocation7 + $0x1d4] ss:$8 sps:$4 sm:$0xff]  }
 0x131   :  { %1579 = vmatpush1.bf16.msra.mxu1 %v2787_v60  ;;  %v2883_v60 = vld [vmem:[#allocation7 + $0x1d0] ss:$8 sps:$4 sm:$0xff]  }
 0x132   :  { %1580 = vmatprep.subr.bf16.mxu1 %v2792_v61  ;;  %v2888_v61 = vld [vmem:[#allocation7 + $0x1e4] ss:$8 sps:$4 sm:$0xff]  }
 0x135   :  { %1581 = vmatpush1.bf16.msra.mxu1 %v2790_v62  ;;  %v2886_v62 = vld [vmem:[#allocation7 + $0x1e0] ss:$8 sps:$4 sm:$0xff]  }
 0x136   :  { %1593 = vmatprep.subr.bf16.mxu1 %v2795_v63  ;;  %v2891_v63 = vld [vmem:[#allocation7 + $0x1f4] ss:$8 sps:$4 sm:$0xff]  }
 0x138   :  { %1583 = vmatmul.mubr.bf16.vlgmr.msra.gmra.mrb[4].mxu1 %v3064_v22  ;;  %v3088_v22 = vld [vmem:[%s3123_s2] sm:$0xf] }
 0x139   :  { %1594 = vmatpush1.bf16.msra.mxu1 %v2793_v0  ;;  %1625 = vmatprep.mubr.bf16.mxu1 %v2971_v28  ;;  %v294_v28 = vsub.s32 1, %v3080_v6  ;;  %v2889_v0 = vld [vmem:[#allocation7 + $0x1f0] ss:$8 sps:$4 sm:$0xff]  }
 0x13b   :  { %v295_v8 = vrot.slane %v3088_v22, %v294_v28 }
 0x144   :  { %2387 = vmatmul.mubr.msk.bf16.vlgmr.msra.gmra.mrb[4].mxu1 %vm1288_vm0, %v3070_v34  ;;  %v291_v34 = vrot.slane %v3088_v22, %v3083_v7 }
 0x14b   :  { %v1326_v1 = vpop.f32.mrb[0].mxu1 }
 0x14c   :  { %v1328_v2 = vpop.f32.mrb[1].mxu1  ;;  %v1327_v9 = vadd.f32 %v1326_v1, %v291_v34  ;;  %v298_v1 = vsub.s32 2, %v3080_v6 }
 0x14d   :  { %v1330_v3 = vpop.f32.mrb[2].mxu1  ;;  %v1329_v10 = vadd.f32 %v1328_v2, %v295_v8  ;;  %v302_v2 = vsub.s32 3, %v3080_v6 }
 0x14e   :  { %v1332_v4 = vpop.f32.mrb[3].mxu1  ;;  %v1331_v13 = vadd.f32 %v1330_v3, %v291_v34  ;;  %v299_v3 = vrot.slane %v3088_v22, %v298_v1 }
 0x14f   :  { %v1333_v17 = vadd.f32 %v1332_v4, %v295_v8  ;;  %v303_v4 = vrot.slane %v3088_v22, %v302_v2  ;;  %v2146_v22 = vld [vmem:[%s3126_s5] sm:$0x3] }
 0x198   :  { %v1455_v11 = vpop.f32.mrb[0].mxu0 }
 0x199   :  { %v2453_v14 = vadd.f32 %v1455_v11, %v1327_v9  ;;  %v1457_v16 = vpop.f32.mrb[1].mxu0 }
 0x19a   :  { %v2455_v18 = vadd.f32 %v1457_v16, %v1329_v10  ;;  %v1459_v19 = vpop.f32.mrb[2].mxu0 }
 0x19b   :  { %v1636_v20 = vmul.f32 0.2, %v2453_v14  ;;  %v2457_v21 = vadd.f32 %v1459_v19, %v1331_v13  ;;  %v1461_v23 = vpop.f32.mrb[3].mxu0 }
 0x19c   :  { %v1637_v24 = vmul.f32 0.2, %v2455_v18  ;;  %v2459_v25 = vadd.f32 %v1461_v23, %v1333_v17 }
 0x19d   :  { %v1640_v26 = vmul.f32 0.2, %v2457_v21  ;;  %v1644_v29 = vmax.f32 %v2453_v14, %v1636_v20 }
 0x19e   :  { %v1641_v27 = vmul.f32 0.2, %v2459_v25  ;;  %v1645_v31 = vmax.f32 %v2455_v18, %v1637_v24 }
 0x19f   :  { %v1648_v30 = vmax.f32 %v2457_v21, %v1640_v26 }
 0x1a0   :  { %v1649_v32 = vmax.f32 %v2459_v25, %v1641_v27  ;;  %v1720_v27 = vld [vmem:[%s3125_s4] sm:$0x3] }
 0x1a1   :  { %v1652_v15 = vpack.c.bf16 %v1648_v30, %v1644_v29  ;;  %v2147_v29 = vunpack.c.l.bf16 %v2146_v22  ;;  %v1725_v30 = vrot.slane %v1720_v27, %v3083_v7 }
 0x1a2   :  { %v1653_v44 = vpack.c.bf16 %v1649_v32, %v1645_v31  ;;  %v1729_v31 = vrot.slane %v1720_v27, %v294_v28 }
 0x1a3   :  { %v2152_v32 = vrot.slane %v2147_v29, %v3083_v7 }
 0x1a4   :  { %2084 = vmatprep.mubr.bf16.mxu0 %v1653_v44  ;;  %v2156_v44 = vrot.slane %v2147_v29, %v298_v1 }
 0x1a5   :  { %2085 = vmatmul.mubr.bf16.vlgmr.msra.gmra.mrb[4].mxu0 %v1652_v15 }
 0x1a6   :  { %2096 = vmatpush1.bf16.msra.mxu0 %v2844_v33 }
 0x1a7   :  { %2097 = vmatprep.subr.bf16.mxu0 %v2849_v12 }
 0x1aa   :  { %2098 = vmatpush1.bf16.msra.mxu0 %v2847_v35 }
 0x1ab   :  { %2099 = vmatprep.subr.bf16.mxu0 %v2852_v36 }
 0x1ae   :  { %2100 = vmatpush1.bf16.msra.mxu0 %v2850_v37 }
 0x1af   :  { %2101 = vmatprep.subr.bf16.mxu0 %v2855_v38 }
 0x1b2   :  { %2102 = vmatpush1.bf16.msra.mxu0 %v2853_v55 }
 0x1b3   :  { %2103 = vmatprep.subr.bf16.mxu0 %v2858_v39  ;;  %v2162_v39 = vrot.slane %v2152_v32, %v3083_v7 }
 0x1b6   :  { %2104 = vmatpush1.bf16.msra.mxu0 %v2856_v40 }
 0x1b7   :  { %2105 = vmatprep.subr.bf16.mxu0 %v2861_v41 }
 0x1ba   :  { %2106 = vmatpush1.bf16.msra.mxu0 %v2859_v42  ;;  %v2166_v42 = vrot.slane %v2156_v44, %v3083_v7 }
 0x1bb   :  { %2107 = vmatprep.subr.bf16.mxu0 %v2864_v43 }
 0x1be   :  { %2108 = vmatpush1.bf16.msra.mxu0 %v2862_v45 }
 0x1bf   :  { %2109 = vmatprep.subr.bf16.mxu0 %v2867_v46 }
 0x1c2   :  { %2110 = vmatpush1.bf16.msra.mxu0 %v2865_v47 }
 0x1c3   :  { %2111 = vmatprep.subr.bf16.mxu0 %v2870_v48 }
 0x1c6   :  { %2112 = vmatpush1.bf16.msra.mxu0 %v2868_v49 }
 0x1c7   :  { %2113 = vmatprep.subr.bf16.mxu0 %v2873_v50 }
 0x1ca   :  { %2114 = vmatpush1.bf16.msra.mxu0 %v2871_v51 }
 0x1cb   :  { %2115 = vmatprep.subr.bf16.mxu0 %v2876_v52 }
 0x1ce   :  { %2116 = vmatpush1.bf16.msra.mxu0 %v2874_v53 }
 0x1cf   :  { %2117 = vmatprep.subr.bf16.mxu0 %v2879_v54  ;;  %v2178_v54 = vstv %s3127_s6 }
 0x1d2   :  { %2118 = vmatpush1.bf16.msra.mxu0 %v2877_v56 }
 0x1d3   :  { %2119 = vmatprep.subr.bf16.mxu0 %v2882_v57 }
 0x1d6   :  { %2120 = vmatpush1.bf16.msra.mxu0 %v2880_v58 }
 0x1d7   :  { %2121 = vmatprep.subr.bf16.mxu0 %v2885_v59 }
 0x1da   :  { %2122 = vmatpush1.bf16.msra.mxu0 %v2883_v60 }
 0x1db   :  { %2123 = vmatprep.subr.bf16.mxu0 %v2888_v61 }
 0x1de   :  { %2124 = vmatpush1.bf16.msra.mxu0 %v2886_v62 }
 0x1df   :  { %2125 = vmatprep.subr.bf16.mxu0 %v2891_v63 }
 0x1e2   :  { %2126 = vmatpush1.bf16.msra.mxu0 %v2889_v0 }
 0x217   :  { %v1627_v5 = vpop.f32.mrb[4].mxu1 }
 0x218   :  { %v2460_v34 = vadd.f32 %v1627_v5, %v299_v3  ;;  %v1629_v8 = vpop.f32.mrb[5].mxu1 }
 0x219   :  { %v2461_v9 = vadd.f32 %v1629_v8, %v303_v4  ;;  %v1631_v10 = vpop.f32.mrb[6].mxu1 }
 0x21a   :  { %v1638_v11 = vmul.f32 0.2, %v2460_v34  ;;  %v2462_v13 = vadd.f32 %v1631_v10, %v299_v3  ;;  %v1633_v14 = vpop.f32.mrb[7].mxu1 }
 0x21b   :  { %v1639_v16 = vmul.f32 0.2, %v2461_v9  ;;  %v2463_v17 = vadd.f32 %v1633_v14, %v303_v4 }
 0x21c   :  { %v1642_v18 = vmul.f32 0.2, %v2462_v13  ;;  %v1646_v20 = vmax.f32 %v2460_v34, %v1638_v11 }
 0x21d   :  { %v1643_v19 = vmul.f32 0.2, %v2463_v17  ;;  %v1647_v23 = vmax.f32 %v2461_v9, %v1639_v16 }
 0x21e   :  { %v1650_v21 = vmax.f32 %v2462_v13, %v1642_v18 }
 0x21f   :  { %v1651_v24 = vmax.f32 %v2463_v17, %v1643_v19 }
 0x220   :  { %v1654_v25 = vpack.c.bf16 %v1650_v21, %v1646_v20 }
 0x221   :  { %v1655_v26 = vpack.c.bf16 %v1651_v24, %v1647_v23 }
 0x223   :  { %2127 = vmatprep.mubr.bf16.mxu0 %v1655_v26 }
 0x224   :  { %2128 = vmatmul.mubr.bf16.vlgmr.msra.gmra.mrb[4].mxu0 %v1654_v25 }
 0x2f7   :  { %v2129_v15 = vpop.f32.mrb[4].mxu0 }
 0x2f8   :  { %v2464_v33 = vadd.f32 %v2129_v15, %v1725_v30  ;;  %v2131_v12 = vpop.f32.mrb[5].mxu0 }
 0x2f9   :  { %v2465_v35 = vadd.f32 %v2131_v12, %v1729_v31  ;;  %v2133_v36 = vpop.f32.mrb[6].mxu0 }
 0x2fa   :  { %v2138_v37 = vmul.f32 0.2, %v2464_v33  ;;  %v2466_v38 = vadd.f32 %v2133_v36, %v1725_v30  ;;  %v2135_v55 = vpop.f32.mrb[7].mxu0 }
 0x2fb   :  { %v2139_v40 = vmul.f32 0.2, %v2465_v35  ;;  %v2467_v41 = vadd.f32 %v2135_v55, %v1729_v31 }
 0x2fc   :  { %v2142_v43 = vmax.f32 %v2464_v33, %v2138_v37  ;;  %v2140_v6 = vmul.f32 0.2, %v2466_v38 }
 0x2fd   :  { %v2143_v28 = vmax.f32 %v2465_v35, %v2139_v40  ;;  %v2141_v45 = vmul.f32 0.2, %v2467_v41 }
 0x2fe   :  { %v2144_v46 = vmax.f32 %v2466_v38, %v2140_v6  ;;  %v2167_v47 = vmul.f32 %v2162_v39, %v2142_v43 }
 0x2ff   :  { %v2145_v48 = vmax.f32 %v2467_v41, %v2141_v45  ;;  %v2168_v49 = vmul.f32 %v2166_v42, %v2143_v28 }
 0x300   :  { %v2169_v50 = vmul.f32 %v2162_v39, %v2144_v46 }
 0x301   :  { %v2171_v51 = vadd.f32 %v2168_v49, %v2167_v47  ;;  %v2170_v52 = vmul.f32 %v2166_v42, %v2145_v48 }
 0x303   :  { %2172 = vadd.xlane.f32.xlu0 %v2171_v51  ;;  %v2174_v53 = vadd.f32 %v2170_v52, %v2169_v50 }
 0x307   :  { %2175 = vadd.xlane.f32.xlu0 %v2174_v53 }
 0x390   :  { %v2173_v7 = vpop.xlane.xlu0 %2172 }
 0x391   :  { %v2179_v56 = vadd.f32 %v2178_v54, %v2173_v7 }
 0x393   :  { %2182 = vst.msk [vmem:[%s3128_s7] sm:$0xff] %vm2181_vm1, %v2179_v56 }
 0x394   :  { %v2176_v57 = vpop.xlane.xlu0 %2175 }
 0x395   :  { %v2180_v58 = vadd.f32 %v2178_v54, %v2176_v57 }
 0x397   :  { %2183 = vst.msk [vmem:[%s3128_s7 + $0x8] sm:$0xff] %vm2181_vm1, %v2180_v58 }
 0x398   :  { %2188 = vsyncpa [#allocation4], 1 }
 0x399   :  { %2189 = vsyncpa [#allocation6], 1 }

</bundles_post_ra>
